<compile_context>
chip_gen: v6e
topology: v6e:2x2x1
jax: 0.10.0
libtpu: 0.0.40
codegen_flags: <defaults>
</compile_context>

<pallas_src>
import functools

import jax
import jax.numpy as jnp
from jax.experimental import pallas as pl
from jax.experimental.pallas import tpu as pltpu


def _round_up(x, m):
    return ((x + m - 1) // m) * m


def _choose_tile(batch, n_times, tile_b):
    """Pick (TILE_B, padded_B).

    TILE_B is either the whole (8-rounded) batch or a multiple of 128, so every
    BlockSpec (including the lane-major transposed injection block) stays legal.
    """
    b8 = _round_up(max(int(batch), 1), 8)
    tile_b = max(128, (int(tile_b) // 128) * 128)
    # With a single time point, split a large batch so the grid has >= 2 parallel
    # steps (keeps both v7x TensorCores busy; harmless on v5e/v6e).
    want_split = (n_times == 1 and b8 >= 256)
    if b8 <= tile_b and not want_split:
        return b8, b8
    n_tiles = max(2 if want_split else 1, -(-b8 // tile_b))
    tile = _round_up(-(-b8 // n_tiles), 128)
    return tile, _round_up(b8, tile)


# --------------------------------------------------------------------------- kernel
def _odef_kernel(ts_ref, state_ref, injt_ref, injd_ref, sbias_ref,
                 w1h_ref, w1d_ref, w2_ref, b2_ref, out_ref,
                 *, inv_two_sigma_sq, lane_dense_dose):
    # scalar t for this time step (inner grid axis), read from SMEM.
    t = ts_ref[pl.program_id(1)]

    # dose pulse: clamp(sum_j dose_j * exp(-(t - time_j)^2 / (2 sigma^2)), 0, 100)
    if lane_dense_dose:
        # injection times arrive transposed (N, TILE_B): the exp runs with the
        # batch in lanes (dense vregs), then one XLU transpose restores row-major.
        diff = t - injt_ref[...]                                           # (N, TB)
        gauss = jnp.transpose(jnp.exp(-(diff * diff) * inv_two_sigma_sq))  # (TB, N)
    else:
        diff = t - injt_ref[...]                                           # (TB, N)
        gauss = jnp.exp(-(diff * diff) * inv_two_sigma_sq)
    dose = jnp.sum(injd_ref[...] * gauss, axis=1, keepdims=True)           # (TB, 1)
    dose = jnp.clip(dose, 0.0, 100.0)

    # net: Linear(H+S+1 -> 64), Tanh, Linear(64 -> H)
    # The static-feature part of the first Linear (+ b1) is pre-folded into sbias;
    # the dose column is a rank-1 update.
    pre = (jnp.dot(state_ref[...], w1h_ref[...],
                   preferred_element_type=jnp.float32)
           + sbias_ref[...]                    # (TB, 64): static @ W1_s + b1
           + dose * w1d_ref[...])              # (TB,1)*(1,64) broadcast
    h = jnp.tanh(pre)
    out_ref[...] = (jnp.dot(h, w2_ref[...], preferred_element_type=jnp.float32)
                    + b2_ref[...])             # (1, H) broadcast


# ------------------------------------------------------------------- param re-layout
def prepare_params(params, hidden_dim, static_dim, dose_dim=1):
    """One-time weight re-layout (call once, outside the solver loop)."""
    assert dose_dim == 1, "kernel assumes a scalar dose input"
    w1 = jnp.asarray(params["w1"], jnp.float32)
    b1 = jnp.asarray(params["b1"], jnp.float32)
    w2 = jnp.asarray(params["w2"], jnp.float32)
    b2 = jnp.asarray(params["b2"], jnp.float32)
    H, S = int(hidden_dim), int(static_dim)
    assert w1.shape == (H + S + dose_dim, 64)
    assert w2.shape == (64, H)
    return {
        "H": H, "S": S,
        "w1_h": w1[:H, :],                  # (H, 64)  state rows
        "w1_s": w1[H:H + S, :],             # (S, 64)  static rows (folded outside)
        "w1_d": w1[H + S:, :],              # (1, 64)  dose row
        "b1":   b1.reshape(1, 64),
        "w2":   w2,                         # (64, H)  unpadded: lane-masked vst is
        "b2":   b2.reshape(1, H),           #           far cheaper than 4x HBM writes
    }


# --------------------------------------------------------------------- pallas driver
def _odef_pallas(ts, states, injection_times, injection_doses, static_bias,
                 prep, sigma, tile_b):
    T, B, H = states.shape
    N = injection_times.shape[1]
    TILE_B, Bp = _choose_tile(B, T, tile_b)
    lane_dense = (TILE_B % 128 == 0)

    inj_t = jnp.transpose(injection_times) if lane_dense else injection_times
    if Bp != B:
        pad = Bp - B
        states = jnp.pad(states, ((0, 0), (0, pad), (0, 0)))
        injection_doses = jnp.pad(injection_doses, ((0, pad), (0, 0)))
        static_bias = jnp.pad(static_bias, ((0, pad), (0, 0)))
        inj_t = jnp.pad(inj_t, ((0, 0), (0, pad)) if lane_dense else ((0, pad), (0, 0)))
    nb = Bp // TILE_B

    if lane_dense:
        injt_spec = pl.BlockSpec((N, TILE_B), lambda i, s: (0, i))   # batch in lanes
    else:
        injt_spec = pl.BlockSpec((TILE_B, N), lambda i, s: (i, 0))

    kernel = functools.partial(
        _odef_kernel,
        inv_two_sigma_sq=1.0 / (2.0 * float(sigma) ** 2),
        lane_dense_dose=lane_dense)

    cost = pl.CostEstimate(
        flops=int(T * Bp * (4 * H * 64 + 4 * N + 4 * 64)),
        transcendentals=int(T * Bp * (N + 64)),
        bytes_accessed=int(4 * (T                       # ts (SMEM)
                                + 2 * T * Bp * H        # states in + out
                                + 2 * Bp * N            # injections, once per tile
                                + Bp * 64               # static bias, once per tile
                                + 2 * H * 64 + 64 + H)  # weights, fetched once
                           ),
    )

    out = pl.pallas_call(
        kernel,
        out_shape=jax.ShapeDtypeStruct((T, Bp, H), jnp.float32),
        grid=(nb, T),                                     # batch tiles outer, time inner
        in_specs=[
            pl.BlockSpec(memory_space=pltpu.MemorySpace.SMEM),        # ts (T,)
            pl.BlockSpec((None, TILE_B, H), lambda i, s: (s, i, 0)),  # states
            injt_spec,                                                # injection times
            pl.BlockSpec((TILE_B, N),  lambda i, s: (i, 0)),          # injection doses
            pl.BlockSpec((TILE_B, 64), lambda i, s: (i, 0)),          # static bias (+b1)
            pl.BlockSpec((H, 64), lambda i, s: (0, 0)),               # w1 state rows
            pl.BlockSpec((1, 64), lambda i, s: (0, 0)),               # w1 dose row
            pl.BlockSpec((64, H), lambda i, s: (0, 0)),               # w2
            pl.BlockSpec((1, H),  lambda i, s: (0, 0)),               # b2
        ],
        out_specs=pl.BlockSpec((None, TILE_B, H), lambda i, s: (s, i, 0)),
        compiler_params=pltpu.CompilerParams(
            dimension_semantics=("parallel", "parallel")),
        cost_estimate=cost,
    )(ts, states, inj_t, injection_doses, static_bias,
      prep["w1_h"], prep["w1_d"], prep["w2"], prep["b2"])

    return out[:, :B, :] if Bp != B else out


def odef_forward_multi(ts, states, static_embed, injection_times, injection_doses,
                       params, sigma=1.0, tile_b=2048):
    """Fused evaluation of the dynamics at T (t, state) pairs in ONE pallas_call.

    ts: (T,)  states: (T, B, H)  static_embed: (B, S)  injections: (B, N) -> (T, B, H)
    """
    prep = params if "w1_h" in params else prepare_params(
        params, states.shape[-1], static_embed.shape[-1])
    T = states.shape[0]
    # t-invariant static contribution, computed once outside the kernel (removes
    # the (T, B, H+S) concat/broadcast round-trip through HBM).
    static_bias = (jnp.dot(static_embed.astype(jnp.float32), prep["w1_s"],
                           precision=jax.lax.Precision.HIGHEST)
                   + prep["b1"])                                       # (B, 64)
    return _odef_pallas(jnp.asarray(ts, jnp.float32).reshape(T),
                        states.astype(jnp.float32),
                        injection_times.astype(jnp.float32),
                        injection_doses.astype(jnp.float32),
                        static_bias, prep, sigma, tile_b)


def odef_forward(t, state, static_embed, injection_times, injection_doses,
                 params, sigma=1.0, tile_b=2048):
    """Single-evaluation ODEF forward matching the PyTorch module: (B,H) -> (B,H)."""
    out = odef_forward_multi(jnp.asarray(t, jnp.float32).reshape(1), state[None],
                             static_embed, injection_times, injection_doses,
                             params, sigma=sigma, tile_b=tile_b)
    return out[0]


# -------------------------------------------------------------------- pure-JAX check
def odef_reference(t, state, static_embed, injection_times, injection_doses,
                   params, sigma=1.0):
    dose = jnp.sum(injection_doses
                   * jnp.exp(-(t - injection_times) ** 2 / (2.0 * sigma ** 2)),
                   axis=1, keepdims=True)
    dose = jnp.clip(dose, 0.0, 100.0)
    inp = jnp.concatenate([state, static_embed, dose], axis=-1)
    h = jnp.tanh(jnp.dot(inp, params["w1"],
                         precision=jax.lax.Precision.HIGHEST) + params["b1"])
    return jnp.dot(h, params["w2"],
                   precision=jax.lax.Precision.HIGHEST) + params["b2"]


def init_params(key, hidden_dim, static_dim, dose_dim=1):
    in_dim = hidden_dim + static_dim + dose_dim
    k1, k2, k3, k4 = jax.random.split(key, 4)
    lim1 = 1.0 / jnp.sqrt(in_dim)
    lim2 = 1.0 / jnp.sqrt(64.0)
    return {
        "w1": jax.random.uniform(k1, (in_dim, 64), jnp.float32, -lim1, lim1),
        "b1": jax.random.uniform(k2, (64,), jnp.float32, -lim1, lim1),
        "w2": jax.random.uniform(k3, (64, hidden_dim), jnp.float32, -lim2, lim2),
        "b2": jax.random.uniform(k4, (hidden_dim,), jnp.float32, -lim2, lim2),
    }


if __name__ == "__main__":
    B, HIDDEN, STATIC, N_INJ, T = 8, 32, 8, 8, 4
    key = jax.random.PRNGKey(0)
    kp, ks, ke, kt, kd, ktt, kst = jax.random.split(key, 7)

    params = init_params(kp, HIDDEN, STATIC)
    prep = prepare_params(params, HIDDEN, STATIC)   # hoisted out of the "solver loop"

    state = jax.random.normal(ks, (B, HIDDEN), jnp.float32)
    static_embed = jax.random.normal(ke, (B, STATIC), jnp.float32)
    injection_times = jax.random.uniform(kt, (B, N_INJ), jnp.float32, 0.0, 10.0)
    injection_doses = jax.random.uniform(kd, (B, N_INJ), jnp.float32, 0.0, 5.0)
    t = 3.5

    # --- single evaluation (the module's forward) ---
    out = jax.block_until_ready(
        odef_forward(t, state, static_embed, injection_times, injection_doses, prep))
    ref = odef_reference(t, state, static_embed, injection_times, injection_doses, params)
    assert out.shape == (B, HIDDEN)
    assert jnp.allclose(out, ref, atol=1e-5, rtol=1e-5), "single-eval mismatch vs reference"

    # --- fused multi-evaluation (several RK stages / time points, one launch) ---
    ts = jax.random.uniform(ktt, (T,), jnp.float32, 0.0, 10.0)
    states = jax.random.normal(kst, (T, B, HIDDEN), jnp.float32)
    outs = jax.block_until_ready(
        odef_forward_multi(ts, states, static_embed,
                           injection_times, injection_doses, prep))
    refs = jnp.stack([odef_reference(ts[s], states[s], static_embed,
                                     injection_times, injection_doses, params)
                      for s in range(T)])
    assert outs.shape == (T, B, HIDDEN)
    assert jnp.allclose(outs, refs, atol=1e-5, rtol=1e-5), "multi-eval mismatch vs reference"

    print("KERNEL_OK")
</pallas_src>

<mosaic_0001>
module attributes {stable_mosaic.version = 11 : i64} {
  func.func @_odef_kernel(%arg0: i32, %arg1: i32, %arg2: memref<1xf32, #tpu.memory_space<smem>>, %arg3: memref<1x8x32xf32, #tpu.memory_space<vmem>>, %arg4: memref<8x8xf32, #tpu.memory_space<vmem>>, %arg5: memref<8x8xf32, #tpu.memory_space<vmem>>, %arg6: memref<8x64xf32, #tpu.memory_space<vmem>>, %arg7: memref<32x64xf32, #tpu.memory_space<vmem>>, %arg8: memref<1x64xf32, #tpu.memory_space<vmem>>, %arg9: memref<64x32xf32, #tpu.memory_space<vmem>>, %arg10: memref<1x32xf32, #tpu.memory_space<vmem>>, %arg11: memref<1x8x32xf32, #tpu.memory_space<vmem>>) attributes {dimension_semantics = [#tpu.dimension_semantics<parallel>, #tpu.dimension_semantics<parallel>], iteration_bounds = array<i64: 1, 1>, scalar_prefetch = 0 : i64, scratch_operands = 0 : i64, tpu.core_type = #tpu.core_type<tc>, window_params = [{transform_indices = @transform_0, window_bounds = array<i64: 1>}, {transform_indices = @transform_1, window_bounds = array<i64: 1, 8, 32>}, {transform_indices = @transform_2, window_bounds = array<i64: 8, 8>}, {transform_indices = @transform_3, window_bounds = array<i64: 8, 8>}, {transform_indices = @transform_4, window_bounds = array<i64: 8, 64>}, {pipeline_mode = #tpu.pipeline_mode<synchronous>, transform_indices = @transform_5, window_bounds = array<i64: 32, 64>}, {pipeline_mode = #tpu.pipeline_mode<synchronous>, transform_indices = @transform_6, window_bounds = array<i64: 1, 64>}, {pipeline_mode = #tpu.pipeline_mode<synchronous>, transform_indices = @transform_7, window_bounds = array<i64: 64, 32>}, {pipeline_mode = #tpu.pipeline_mode<synchronous>, transform_indices = @transform_8, window_bounds = array<i64: 1, 32>}, {transform_indices = @transform_9, window_bounds = array<i64: 1, 8, 32>}]} {
    %0 = arith.index_cast %arg1 : i32 to index
    %1 = memref.load %arg2[%0] : memref<1xf32, #tpu.memory_space<smem>>
    %c0 = arith.constant 0 : index
    %c0_0 = arith.constant 0 : index
    %2 = vector.load %arg4[%c0, %c0_0] : memref<8x8xf32, #tpu.memory_space<vmem>>, vector<8x8xf32>
    %3 = vector.broadcast %1 : f32 to vector<8x8xf32>
    %4 = arith.subf %3, %2 : vector<8x8xf32>
    %5 = arith.mulf %4, %4 : vector<8x8xf32>
    %cst = arith.constant 0.000000e+00 : f32
    %6 = vector.broadcast %cst : f32 to vector<8x8xf32>
    %7 = arith.subf %6, %5 : vector<8x8xf32>
    %cst_1 = arith.constant 5.000000e-01 : f32
    %8 = vector.broadcast %cst_1 : f32 to vector<8x8xf32>
    %9 = arith.mulf %7, %8 : vector<8x8xf32>
    %10 = math.exp %9 : vector<8x8xf32>
    %c0_2 = arith.constant 0 : index
    %c0_3 = arith.constant 0 : index
    %11 = vector.load %arg5[%c0_2, %c0_3] : memref<8x8xf32, #tpu.memory_space<vmem>>, vector<8x8xf32>
    %12 = arith.mulf %11, %10 : vector<8x8xf32>
    %cst_4 = arith.constant dense<0.000000e+00> : vector<8xf32>
    %13 = vector.multi_reduction <add>, %12, %cst_4 [1] : vector<8x8xf32> to vector<8xf32>
    %14 = vector.shape_cast %13 : vector<8xf32> to vector<8x1xf32>
    %cst_5 = arith.constant 0.000000e+00 : f32
    %cst_6 = arith.constant 1.000000e+02 : f32
    %15 = vector.broadcast %cst_5 : f32 to vector<8x1xf32>
    %16 = arith.maximumf %15, %14 : vector<8x1xf32>
    %17 = vector.broadcast %cst_6 : f32 to vector<8x1xf32>
    %18 = arith.minimumf %17, %16 : vector<8x1xf32>
    %c0_7 = arith.constant 0 : index
    %c0_8 = arith.constant 0 : index
    %c0_9 = arith.constant 0 : index
    %19 = vector.load %arg3[%c0_7, %c0_8, %c0_9] : memref<1x8x32xf32, #tpu.memory_space<vmem>>, vector<1x8x32xf32>
    %20 = vector.shape_cast %19 : vector<1x8x32xf32> to vector<8x32xf32>
    %c0_10 = arith.constant 0 : index
    %c0_11 = arith.constant 0 : index
    %21 = vector.load %arg7[%c0_10, %c0_11] : memref<32x64xf32, #tpu.memory_space<vmem>>, vector<32x64xf32>
    %cst_12 = arith.constant dense<0.000000e+00> : vector<8x64xf32>
    %22 = tpu.matmul %20, %21, %cst_12 {dimension_numbers = #tpu.dot_dimension_numbers<[1], [0], [0], [1], [0, 0, 1, 1], [], []>} : vector<8x32xf32>, vector<32x64xf32>, vector<8x64xf32> -> vector<8x64xf32>
    %c0_13 = arith.constant 0 : index
    %c0_14 = arith.constant 0 : index
    %23 = vector.load %arg6[%c0_13, %c0_14] : memref<8x64xf32, #tpu.memory_space<vmem>>, vector<8x64xf32>
    %24 = arith.addf %22, %23 : vector<8x64xf32>
    %c0_15 = arith.constant 0 : index
    %c0_16 = arith.constant 0 : index
    %25 = vector.load %arg8[%c0_15, %c0_16] : memref<1x64xf32, #tpu.memory_space<vmem>>, vector<1x64xf32>
    %26 = vector.broadcast %18 : vector<8x1xf32> to vector<8x64xf32>
    %27 = vector.broadcast %25 : vector<1x64xf32> to vector<8x64xf32>
    %28 = arith.mulf %26, %27 : vector<8x64xf32>
    %29 = arith.addf %24, %28 : vector<8x64xf32>
    %30 = math.tanh %29 : vector<8x64xf32>
    %c0_17 = arith.constant 0 : index
    %c0_18 = arith.constant 0 : index
    %31 = vector.load %arg9[%c0_17, %c0_18] : memref<64x32xf32, #tpu.memory_space<vmem>>, vector<64x32xf32>
    %cst_19 = arith.constant dense<0.000000e+00> : vector<8x32xf32>
    %32 = tpu.matmul %30, %31, %cst_19 {dimension_numbers = #tpu.dot_dimension_numbers<[1], [0], [0], [1], [0, 0, 1, 1], [], []>} : vector<8x64xf32>, vector<64x32xf32>, vector<8x32xf32> -> vector<8x32xf32>
    %c0_20 = arith.constant 0 : index
    %c0_21 = arith.constant 0 : index
    %33 = vector.load %arg10[%c0_20, %c0_21] : memref<1x32xf32, #tpu.memory_space<vmem>>, vector<1x32xf32>
    %34 = vector.broadcast %33 : vector<1x32xf32> to vector<8x32xf32>
    %35 = arith.addf %32, %34 : vector<8x32xf32>
    %c0_22 = arith.constant 0 : index
    %c0_23 = arith.constant 0 : index
    %c0_24 = arith.constant 0 : index
    %36 = vector.load %arg11[%c0_22, %c0_23, %c0_24] : memref<1x8x32xf32, #tpu.memory_space<vmem>>, vector<1x8x32xf32>
    %37 = vector.shape_cast %36 : vector<1x8x32xf32> to vector<8x32xf32>
    %38 = vector.shape_cast %35 : vector<8x32xf32> to vector<1x8x32xf32>
    tpu.vector_store %arg11[%c0_22, %c0_23, %c0_24], %38 {strides = array<i32>} : memref<1x8x32xf32, #tpu.memory_space<vmem>>, vector<1x8x32xf32>,
    return
  }
  func.func @transform_0(%arg0: i32, %arg1: i32) -> i32 {
    %c0_i32 = arith.constant 0 : i32
    %c0_i32_0 = arith.constant 0 : i32
    return %c0_i32 : i32
  }
  func.func @transform_1(%arg0: i32, %arg1: i32) -> (i32, i32, i32) {
    %c0_i32 = arith.constant 0 : i32
    %c0_i32_0 = arith.constant 0 : i32
    return %arg1, %arg0, %c0_i32 : i32, i32, i32
  }
  func.func @transform_2(%arg0: i32, %arg1: i32) -> (i32, i32) {
    %c0_i32 = arith.constant 0 : i32
    %c0_i32_0 = arith.constant 0 : i32
    return %arg0, %c0_i32 : i32, i32
  }
  func.func @transform_3(%arg0: i32, %arg1: i32) -> (i32, i32) {
    %c0_i32 = arith.constant 0 : i32
    %c0_i32_0 = arith.constant 0 : i32
    return %arg0, %c0_i32 : i32, i32
  }
  func.func @transform_4(%arg0: i32, %arg1: i32) -> (i32, i32) {
    %c0_i32 = arith.constant 0 : i32
    %c0_i32_0 = arith.constant 0 : i32
    return %arg0, %c0_i32 : i32, i32
  }
  func.func @transform_5(%arg0: i32, %arg1: i32) -> (i32, i32) {
    %c0_i32 = arith.constant 0 : i32
    %c0_i32_0 = arith.constant 0 : i32
    %c0_i32_1 = arith.constant 0 : i32
    return %c0_i32, %c0_i32_0 : i32, i32
  }
  func.func @transform_6(%arg0: i32, %arg1: i32) -> (i32, i32) {
    %c0_i32 = arith.constant 0 : i32
    %c0_i32_0 = arith.constant 0 : i32
    %c0_i32_1 = arith.constant 0 : i32
    return %c0_i32, %c0_i32_0 : i32, i32
  }
  func.func @transform_7(%arg0: i32, %arg1: i32) -> (i32, i32) {
    %c0_i32 = arith.constant 0 : i32
    %c0_i32_0 = arith.constant 0 : i32
    %c0_i32_1 = arith.constant 0 : i32
    return %c0_i32, %c0_i32_0 : i32, i32
  }
  func.func @transform_8(%arg0: i32, %arg1: i32) -> (i32, i32) {
    %c0_i32 = arith.constant 0 : i32
    %c0_i32_0 = arith.constant 0 : i32
    %c0_i32_1 = arith.constant 0 : i32
    return %c0_i32, %c0_i32_0 : i32, i32
  }
  func.func @transform_9(%arg0: i32, %arg1: i32) -> (i32, i32, i32) {
    %c0_i32 = arith.constant 0 : i32
    %c0_i32_0 = arith.constant 0 : i32
    return %arg1, %arg0, %c0_i32 : i32, i32, i32
  }
}

</mosaic_0001>

<bundles_post_ra>
// kernel: tpu_custom_call.1
= control target key start
LH: loop header
LB: loop body
LE: loop exit
PB: predicated region body
PF: predicated region fallthrough
CT: control target
= control target key end

     0   :  { %v322_v2 = vmov 0.0   ;;  %vm323_vm0 = vmmov 0   ;;  %s437_s0 = inlined_call_operand.<no memory space> [shape: f32[1], index: 0, kind: input, shape index: {}]   ;;  %s438_s1 = inlined_call_operand.vmem [shape: f32[1,8,32], index: 1, kind: input, shape index: {}]   ;;  %s439_s2 = inlined_call_operand.vmem [shape: f32[8,8], index: 2, kind: input, shape index: {}]   ;;  %s440_s3 = inlined_call_operand.vmem [shape: f32[8,8], index: 3, kind: input, shape index: {}]   ;;  %s441_s4 = inlined_call_operand.vmem [shape: f32[8,64], index: 4, kind: input, shape index: {}]   ;;  %s442_s5 = inlined_call_operand.vmem [shape: f32[32,64], index: 5, kind: input, shape index: {}]   ;;  %s443_s6 = inlined_call_operand.vmem [shape: f32[1,64], index: 6, kind: input, shape index: {}]   ;;  %s444_s7 = inlined_call_operand.vmem [shape: f32[64,32], index: 7, kind: input, shape index: {}]   ;;  %s445_s8 = inlined_call_operand.vmem [shape: f32[1,32], index: 8, kind: input, shape index: {}]   ;;  %s446_s9 = inlined_call_operand.hbm [shape: f32[1,8,32], index: 9, kind: output, shape index: {}]  }
   0x1   :  { %v55_v0 = vld [vmem:[%s442_s5 + $0x18] sm:$0xff]  ;;  %v36_v1 = vstv %s437_s0  ;;  %263 = vmatprep.subr.mxu0 %v322_v2  ;;  %v54_v3 = vld [vmem:[%s442_s5 + $0x10] sm:$0xff]  ;;  %271 = vmatprep.mubr.msk.f32.mxu0 %vm323_vm0, %v322_v2  ;;  %v35_v4 = vld [vmem:[%s439_s2] sm:$0xff] }
   0x2   :  { %264 = vmatpush3.msra.mxu0 %v55_v0  ;;  %v37_v5 = vsub.f32 %v36_v1, %v35_v4  ;;  %274 = vmatprep.subr.mxu1 %v322_v2 }
   0x3   :  { %15 = vsyncpa [#allocation4], 0  ;;  %265 = vmatprep.subr.mxu0 %v322_v2  ;;  %v53_v6 = vld [vmem:[%s442_s5 + $0x8] sm:$0xff]  ;;  %290 = vmatprep.mubr.msk.f32.mxu1 %vm323_vm0, %v322_v2  ;;  %v52_v8 = vld [vmem:[%s442_s5] sm:$0xff]  ;;  %vm57_vm1 = vcmask 261120   ;;  %vm45_vm2 = vcmask 64512  }
   0x4   :  { %266 = vmatpush3.msra.mxu0 %v54_v3  ;;  %v38_v7 = vmul.f32 %v37_v5, %v37_v5  ;;  %v51_v9 = vld [vmem:[%s438_s1] sm:$0xff]  ;;  %v148_v17 = vld [vmem:[%s444_s7 + $0x38] sm:$0xff]  ;;  %v147_v18 = vld [vmem:[%s444_s7 + $0x30] sm:$0xff]  ;;  %vm156_vm3 = vcmask 523264   ;;  %s324_s19 = smov [#allocation3]  }
   0x5   :  { %267 = vmatprep.subr.mxu0 %v322_v2  ;;  %v43_v13 = vld [vmem:[%s440_s3] sm:$0xff]  ;;  %275 = vmatpush3.msra.mxu1 %v148_v17  ;;  %v146_v19 = vld [vmem:[%s444_s7 + $0x28] sm:$0xff]  ;;  %v144_v21 = vld [vmem:[%s444_s7 + $0x18] sm:$0xff]  ;;  %s237_s20 = sshll.u32 %s324_s19, 4  ;;  %s238_s20 = int_to_ptr.vmem [resolvable:$true] %s237_s20 }
   0x6   :  { %268 = vmatpush3.msra.mxu0 %v53_v6  ;;  %v39_v10 = vsub.f32 0.0, %v38_v7  ;;  %276 = vmatprep.subr.mxu1 %v322_v2  ;;  %v145_v20 = vld [vmem:[%s444_s7 + $0x20] sm:$0xff]  ;;  %v143_v22 = vld [vmem:[%s444_s7 + $0x10] sm:$0xff]  ;;  %v142_v23 = vld [vmem:[%s444_s7 + $0x8] sm:$0xff]  ;;  %p305_p1 = scmp.lt.s32.totalorder %s238_s20, %s238_s20 }
   0x7   :  { %269 = vmatprep.subr.mxu0 %v322_v2  ;;  %277 = vmatpush3.msra.mxu1 %v147_v18  ;;  %v141_v24 = vld [vmem:[%s444_s7] sm:$0xff] }
   0x8   :  { %270 = vmatpush3.msra.mxu0 %v52_v8  ;;  %v40_v11 = vmul.f32 0.5, %v39_v10  ;;  %278 = vmatprep.subr.mxu1 %v322_v2  ;;  %v246_v28 = vld [vmem:[%s443_s6] ss:$0 sm:$0xff] }
   0x9   :  { %272 = vmatmul.mubr.msk.f32.vlgmr.msra.gmra.mxu0 %vm57_vm1, %v51_v9  ;;  %279 = vmatpush3.msra.mxu1 %v146_v19  ;;  %v56_v29 = vld [vmem:[%s441_s4] sm:$0xff]  ;;  %s300_s4 = scalar_lea.vmem %s238_s20, 128 }
   0xa   :  { %v41_v12 = vmul.f32 1.442695, %v40_v11  ;;  %280 = vmatprep.subr.mxu1 %v322_v2  ;;  %v247_v36 = vld [vmem:[%s445_s8] ss:$0 sm:$0xff]  ;;  %p301_p0 = scmp.ne.s32.totalorder %s238_s20, %s300_s4  ;;  %p306_p2 = scmp.lt.s32.totalorder %s300_s4, %s300_s4 }
   0xb   :  { %281 = vmatpush3.msra.mxu1 %v145_v20 }
   0xc   :  { %296 = vpow2.f32 %v41_v12  ;;  %282 = vmatprep.subr.mxu1 %v322_v2  ;;  %p307_p3 = por %p306_p2, %p305_p1 }
   0xd   :  { %283 = vmatpush3.msra.mxu1 %v144_v21 }
   0xe   :  { %284 = vmatprep.subr.mxu1 %v322_v2  ;;  %p308_p4 = pnand %p307_p3, %p301_p0 }
   0xf   :  { %285 = vmatpush3.msra.mxu1 %v143_v22 }
  0x10   :  { %286 = vmatprep.subr.mxu1 %v322_v2 }
  0x11   :  { %287 = vmatpush3.msra.mxu1 %v142_v23 }
  0x12   :  { %288 = vmatprep.subr.mxu1 %v322_v2 }
  0x13   :  { %289 = vmatpush3.msra.mxu1 %v141_v24 }
  0x19   :  { %v297_v14 = vpop.eup %296 }
  0x1a   :  { %v44_v15 = vmul.f32 %v297_v14, %v43_v13 }
  0x1c   :  { %v46_v16 = vsel %vm45_vm2, %v44_v15, 0.0 }
  0x1d   :  { %47 = vadd.xlane.f32.xlu0 %v46_v16 }
  0xa6   :  { %v48_v25 = vpop.xlane.xlu0 %47 }
  0xa7   :  { %v49_v26 = vmax.f32 %v48_v25, 0.0 }
  0xa9   :  { %v50_v27 = vmin.f32 %v49_v26, 100.0 }
  0xab   :  { %v138_v30 = vmul.f32 %v246_v28, %v50_v27 }
  0xc9   :  { %v127_v31 = vpop.f32.mrf.mxu0 }
  0xca   :  { %v128_v32 = vadd.f32 %v127_v31, %v56_v29 }
  0xcb   :  { %v273_v33 = vpop.f32.mrf.mxu0 }
  0xcc   :  { %v139_v34 = vadd.f32 %v138_v30, %v128_v32 }
  0xce   :  { %298 = vtanh.f32 %v139_v34 }
  0xdb   :  { %v299_v35 = vpop.eup %298 }
  0xdc   :  { %291 = vmatmul.mubr.msk.f32.vlgmr.msra.gmra.mxu1 %vm156_vm3, %v299_v35 }
 0x19c   :  { %v226_v37 = vpop.f32.mrf.mxu1 }
 0x19d   :  { %v227_v38 = vadd.f32 %v247_v36, %v226_v37 }
 0x19e   :  { %v292_v39 = vpop.f32.mrf.mxu1 }
 0x19f   :  { %230 = vst.msk [vmem:[#allocation3] sm:$0xff] %vm57_vm1, %v227_v38 }
 0x1a0   :  { %311 = shalt.err (!%p308_p4)
}
 0x1a1   :  { %240 = dma.vmem_to_hbm [thread:$0]  %s238_s20, 128, %s446_s9, [#allocation4]  }
 0x1a2   :  { %320 = dma.done.wait [#allocation4], 128  }
 0x1a3   :  { %321 = vsyncadd [#allocation4], 4294967168 }
 0x1a4   :  { %244 = vsyncpa [#allocation4], 1 }

</bundles_post_ra>
